<compile_context>
chip_gen: v5e
topology: v5e:2x2
jax: 0.10.0
libtpu: 0.0.40
codegen_flags: <defaults>
</compile_context>

<pallas_src>
import math

import jax
import jax.numpy as jnp
from jax.experimental import pallas as pl
from jax.experimental.pallas import tpu as pltpu

_LANE = 512          # lane-dense width (multiple of 128)
_TILE_ROWS = 1024    # rows per grid step -> (1024, 512) f32 tile = 2 MiB
_SCALE = -10.0 / math.log(10.0)   # 10*log10(1/x) == (-10/ln10) * ln(x)


def _psnr_kernel(mse_ref, out_ref):
    mse = mse_ref[...]
    if mse.dtype != jnp.float32:
        mse = mse.astype(jnp.float32)
    out_ref[...] = (jnp.log(mse) * jnp.float32(_SCALE)).astype(out_ref.dtype)


def psnr(mse: jax.Array) -> jax.Array:
    """Elementwise 10*log10(1/mse); matches torch shape/dtype semantics."""
    orig_shape = mse.shape
    n = math.prod(orig_shape) if orig_shape else 1
    flat = mse.reshape(-1)

    # Choose the row count (single-block vs tiled) and pad ONCE to the final
    # slab size.  Pad value 1.0 keeps the tail finite (log(1) == 0).
    rows = pl.cdiv(n, _LANE)
    if rows <= _TILE_ROWS:
        rows_pad = rows
        tiled = False
    else:
        rows_pad = pl.cdiv(rows, _TILE_ROWS) * _TILE_ROWS
        tiled = True

    n_pad = rows_pad * _LANE
    if n_pad != n:
        flat = jnp.pad(flat, (0, n_pad - n), constant_values=1.0)
    slab = flat.reshape(rows_pad, _LANE)

    if not tiled:
        # Small input: one full-extent lane-dense block, no grid.
        out = pl.pallas_call(
            _psnr_kernel,
            out_shape=jax.ShapeDtypeStruct((rows_pad, _LANE), mse.dtype),
            in_specs=[pl.BlockSpec((rows_pad, _LANE), lambda: (0, 0))],
            out_specs=pl.BlockSpec((rows_pad, _LANE), lambda: (0, 0)),
        )(slab)
    else:
        # Large input: 1-D grid over row tiles, auto double-buffered.
        tile_bytes = _TILE_ROWS * _LANE * max(slab.dtype.itemsize, 4)
        out = pl.pallas_call(
            _psnr_kernel,
            out_shape=jax.ShapeDtypeStruct((rows_pad, _LANE), mse.dtype),
            grid=(rows_pad // _TILE_ROWS,),
            in_specs=[pl.BlockSpec((_TILE_ROWS, _LANE), lambda i: (i, 0))],
            out_specs=pl.BlockSpec((_TILE_ROWS, _LANE), lambda i: (i, 0)),
            compiler_params=pltpu.CompilerParams(
                dimension_semantics=("parallel",),
                # in + out, double-buffered, plus headroom (safe on all chips).
                vmem_limit_bytes=max(8 * tile_bytes, 32 * 1024 * 1024),
            ),
        )(slab)

    return out.reshape(-1)[:n].reshape(orig_shape)


if __name__ == "__main__":
    key = jax.random.PRNGKey(0)

    # Primary test: NCHW-shaped per-pixel MSE map (single-block path).
    x = jax.random.uniform(key, (2, 4, 16, 16), dtype=jnp.float32,
                           minval=1e-4, maxval=1.0)
    y = psnr(x)
    jax.block_until_ready(y)
    y_ref = 10.0 * jnp.log10(1.0 / x)
    assert y.shape == x.shape and y.dtype == x.dtype
    assert jnp.allclose(y, y_ref, rtol=1e-5, atol=1e-5)

    # Secondary test: larger input to exercise the tiled (grid) path,
    # including a ragged tail that needs padding.
    key2 = jax.random.PRNGKey(0)
    x2 = jax.random.uniform(key2, (4, 3, 129, 512), dtype=jnp.float32,
                            minval=1e-4, maxval=1.0)
    y2 = psnr(x2)
    jax.block_until_ready(y2)
    y2_ref = 10.0 * jnp.log10(1.0 / x2)
    assert y2.shape == x2.shape and y2.dtype == x2.dtype
    assert jnp.allclose(y2, y2_ref, rtol=1e-5, atol=1e-5)

    print("KERNEL_OK")
</pallas_src>

<mosaic_0001>
module attributes {stable_mosaic.version = 11 : i64} {
  func.func @_psnr_kernel(%arg0: memref<4x512xf32, #tpu.memory_space<vmem>>, %arg1: memref<4x512xf32, #tpu.memory_space<vmem>>) attributes {dimension_semantics = [], scalar_prefetch = 0 : i64, scratch_operands = 0 : i64, tpu.core_type = #tpu.core_type<tc>} {
    %c0 = arith.constant 0 : index
    %c0_0 = arith.constant 0 : index
    %0 = vector.load %arg0[%c0, %c0_0] : memref<4x512xf32, #tpu.memory_space<vmem>>, vector<4x512xf32>
    %1 = math.log %0 : vector<4x512xf32>
    %cst = arith.constant -4.34294462 : f32
    %2 = vector.broadcast %cst : f32 to vector<4x512xf32>
    %3 = arith.mulf %1, %2 : vector<4x512xf32>
    %c0_1 = arith.constant 0 : index
    %c0_2 = arith.constant 0 : index
    %4 = vector.load %arg1[%c0_1, %c0_2] : memref<4x512xf32, #tpu.memory_space<vmem>>, vector<4x512xf32>
    tpu.vector_store %arg1[%c0_1, %c0_2], %3 {strides = array<i32>} : memref<4x512xf32, #tpu.memory_space<vmem>>, vector<4x512xf32>,
    return
  }
}

</mosaic_0001>

<bundles_post_ra>
// kernel: tpu_custom_call.1
= control target key start
LH: loop header
LB: loop body
LE: loop exit
PB: predicated region body
PF: predicated region fallthrough
CT: control target
= control target key end

     0   :  { %6 = vsyncpa [#allocation3], 0  ;;  %s126_s0 = inlined_call_operand.hbm [shape: f32[4,512], index: 0, kind: input, shape index: {}]   ;;  %s127_s1 = inlined_call_operand.hbm [shape: f32[4,512], index: 1, kind: output, shape index: {}]  }
   0x1   :  { %7 = vsyncpa [#allocation4], 0  ;;  %s13_s8 = sshll.u32 %s126_s0, 4  ;;  %s108_s9 = smov [#allocation2]   ;;  %s14_s8 = int_to_ptr.hbm [resolvable:$true] %s13_s8 }
   0x2   :  { %s15_s10 = sshll.u32 %s108_s9, 4  ;;  %s16_s10 = int_to_ptr.vmem [resolvable:$true] %s15_s10 }
   0x3   :  { %18 = dma.hbm_to_vmem [thread:$0]  %s14_s8, 256, %s16_s10, [#allocation3]  }
   0x4   :  { %104 = dma.done.wait [#allocation3], 256  }
   0x5   :  { %105 = vsyncadd [#allocation3], 4294967040  ;;  %v23_v0 = vld [vmem:[#allocation2] sm:$0xff]  ;;  %v24_v1 = vld [vmem:[#allocation2 + $0x8] sm:$0xff]  ;;  %s109_s11 = smov [#allocation5]   ;;  %s40_s0 = sshll.u32 %s127_s1, 4  ;;  %s41_s0 = int_to_ptr.hbm [resolvable:$true] %s40_s0 }
   0x6   :  { %52 = vlog2.f32 %v23_v0  ;;  %s38_s12 = sshll.u32 %s109_s11, 4  ;;  %s39_s12 = int_to_ptr.vmem [resolvable:$true] %s38_s12 }
   0x7   :  { %54 = vlog2.f32 %v24_v1 }
   0xc   :  { %v53_v2 = vpop.eup %52 }
   0xd   :  { %v55_v3 = vpop.eup %54  ;;  %v26_v4 = vmul.f32 0.6931472, %v53_v2 }
   0xe   :  { %v28_v5 = vmul.f32 0.6931472, %v55_v3 }
   0xf   :  { %v29_v6 = vmul.f32 -4.3429446, %v26_v4 }
  0x10   :  { %v30_v7 = vmul.f32 -4.3429446, %v28_v5 }
  0x11   :  { %31 = vst [vmem:[#allocation5] sm:$0xff] %v29_v6 }
  0x12   :  { %32 = vst [vmem:[#allocation5 + $0x8] sm:$0xff] %v30_v7 }
  0x13   :  { %43 = dma.vmem_to_hbm [thread:$0]  %s39_s12, 256, %s41_s0, [#allocation4]  }
  0x14   :  { %106 = dma.done.wait [#allocation4], 256  }
  0x15   :  { %107 = vsyncadd [#allocation4], 4294967040 }
  0x16   :  { %48 = vsyncpa [#allocation3], 1 }
  0x17   :  { %49 = vsyncpa [#allocation4], 1 }

</bundles_post_ra>
